<compile_context>
chip_gen: v7x
topology: tpu7x:2x2x1
jax: 0.10.0
libtpu: 0.0.40
codegen_flags: <defaults>
</compile_context>

<pallas_src>
import math

import jax
import jax.numpy as jnp
from jax.experimental import pallas as pl
from jax.experimental.pallas import tpu as pltpu

LANE = 128     # last-dim (lane) multiple for VMEM blocks
SUBLANE = 8    # second-to-last (sublane) multiple for f32 blocks


def _round_up(n: int, m: int) -> int:
    return ((n + m - 1) // m) * m


def make_mlp_kernel(num_layers: int, layernorm: bool, ln_valid: int, eps: float = 1e-5):
    """Fused MLP forward kernel.

    Ref order: x_ref, w0, b0, ..., w_{L-1}, b_{L-1}, [gamma, beta], out_ref.
    Feature dims are zero-padded to lane multiples by the wrapper; padded
    columns are exact zeros, so LayerNorm divides by the true feature count
    `ln_valid` instead of the padded width.
    """

    def kernel(x_ref, *refs):
        out_ref = refs[-1]
        params = refs[:-1]

        h = x_ref[...]                                       # compute dtype (f32 or bf16)
        for i in range(num_layers):
            w = params[2 * i][...]                           # [in_p, out_p], compute dtype
            b = params[2 * i + 1][...].astype(jnp.float32)   # [1, out_p]
            # MXU matmul, f32 accumulation.
            h = jnp.dot(h, w, preferred_element_type=jnp.float32) + b
            if i != num_layers - 1:
                h = jnp.maximum(h, 0.0)                      # ReLU (f32 on VPU)
                # Feed the next matmul in the weight dtype (bf16 halves MXU feeds).
                h = h.astype(params[2 * (i + 1)].dtype)

        h = h.astype(jnp.float32)
        if layernorm:
            gamma = params[2 * num_layers][...].astype(jnp.float32)      # [1, out_p]
            beta = params[2 * num_layers + 1][...].astype(jnp.float32)   # [1, out_p]
            inv_n = 1.0 / float(ln_valid)
            # One-pass mean / variance (padded lanes are exact zeros -> sums unaffected).
            s1 = jnp.sum(h, axis=-1, keepdims=True)
            s2 = jnp.sum(h * h, axis=-1, keepdims=True)
            mean = s1 * inv_n
            var = s2 * inv_n - mean * mean
            inv_std = jax.lax.rsqrt(var + eps)               # EUP slot (free-ish)
            h = (h - mean) * inv_std * gamma + beta

        out_ref[...] = h.astype(out_ref.dtype)

    return kernel


def mlp_forward(x, weights, biases, ln_params=None, *, eps=1e-5,
                compute_dtype=None, tile_b=128):
    """Fused Pallas MLP forward.

    x        : [batch, input_size]
    weights  : list of [in_i, out_i]   (pre-transposed vs torch's [out, in])
    biases   : list of [out_i]
    ln_params: optional (gamma [out], beta [out])
    """
    num_layers = len(weights)
    layernorm = ln_params is not None
    batch, in_f = x.shape
    out_f = weights[-1].shape[1]
    out_dtype = x.dtype
    compute_dtype = jnp.dtype(compute_dtype if compute_dtype is not None else x.dtype)

    in_dims = [w.shape[0] for w in weights]
    out_dims = [w.shape[1] for w in weights]
    pad_in = [_round_up(d, LANE) for d in in_dims]
    pad_out = [_round_up(d, LANE) for d in out_dims]
    in_p, out_p = pad_in[0], pad_out[-1]

    # Batch tiling: stream [tb, F] activation tiles; params stay resident.
    tb = min(tile_b, _round_up(batch, SUBLANE))
    tb = _round_up(tb, SUBLANE)
    batch_p = _round_up(batch, tb)
    grid = (batch_p // tb,)

    # ----- zero-padded operands (padding is exact zero through the chain) -----
    xp = jnp.zeros((batch_p, in_p), compute_dtype).at[:batch, :in_f].set(
        x.astype(compute_dtype))

    inputs = [xp]
    in_specs = [pl.BlockSpec((tb, in_p), lambda i: (i, 0))]
    for li, (w, b) in enumerate(zip(weights, biases)):
        wp = jnp.zeros((pad_in[li], pad_out[li]), compute_dtype)
        wp = wp.at[: in_dims[li], : out_dims[li]].set(w.astype(compute_dtype))
        bp = jnp.zeros((1, pad_out[li]), jnp.float32)
        bp = bp.at[0, : out_dims[li]].set(b.astype(jnp.float32).reshape(-1))
        inputs += [wp, bp]
        in_specs += [
            pl.BlockSpec((pad_in[li], pad_out[li]), lambda i: (0, 0)),  # resident weight
            pl.BlockSpec((1, pad_out[li]), lambda i: (0, 0)),           # resident bias
        ]
    if layernorm:
        gamma, beta = ln_params
        gp = jnp.zeros((1, out_p), jnp.float32).at[0, :out_f].set(
            gamma.astype(jnp.float32).reshape(-1))
        bb = jnp.zeros((1, out_p), jnp.float32).at[0, :out_f].set(
            beta.astype(jnp.float32).reshape(-1))
        inputs += [gp, bb]
        in_specs += [pl.BlockSpec((1, out_p), lambda i: (0, 0))] * 2

    out_spec = pl.BlockSpec((tb, out_p), lambda i: (i, 0))   # lane-dense output slab

    flops = 2 * batch_p * sum(pi * po for pi, po in zip(pad_in, pad_out))
    bytes_accessed = int(
        sum(a.size * a.dtype.itemsize for a in inputs)
        + batch_p * out_p * jnp.dtype(out_dtype).itemsize)
    transcendentals = batch_p if layernorm else 0

    out_padded = pl.pallas_call(
        make_mlp_kernel(num_layers, layernorm, out_f, eps),
        out_shape=jax.ShapeDtypeStruct((batch_p, out_p), out_dtype),
        grid=grid,
        in_specs=in_specs,
        out_specs=out_spec,
        compiler_params=pltpu.CompilerParams(
            dimension_semantics=("parallel",),   # megacore-shard batch tiles (v7x)
        ),
        cost_estimate=pl.CostEstimate(
            flops=flops,
            transcendentals=transcendentals,
            bytes_accessed=bytes_accessed),
    )(*inputs)

    return out_padded[:batch, :out_f]


def init_mlp_params(key, input_size, hidden_size, output_size, layers):
    """Matches MLP.reset_parameters: W ~ N(0, 1/sqrt(in_features)), b = 0.
    Weights returned pre-transposed to [in, out]."""
    weights, biases = [], []
    for i in range(layers):
        in_f = input_size if i == 0 else hidden_size
        out_f = output_size if i == layers - 1 else hidden_size
        key, sub = jax.random.split(key)
        w = jax.random.normal(sub, (in_f, out_f), jnp.float32) / math.sqrt(in_f)
        weights.append(w)
        biases.append(jnp.zeros((out_f,), jnp.float32))
    return weights, biases


def mlp_reference(x, weights, biases, ln_params=None, eps=1e-5,
                  compute_dtype=jnp.float32):
    """Pure-JAX reference with the same precision policy as the kernel."""
    h = x.astype(compute_dtype)
    n = len(weights)
    for i, (w, b) in enumerate(zip(weights, biases)):
        h = jnp.dot(h, w.astype(compute_dtype),
                    preferred_element_type=jnp.float32) + b.astype(jnp.float32)
        if i != n - 1:
            h = jnp.maximum(h, 0.0).astype(compute_dtype)
    h = h.astype(jnp.float32)
    if ln_params is not None:
        gamma, beta = ln_params
        mean = jnp.mean(h, axis=-1, keepdims=True)
        var = jnp.mean((h - mean) ** 2, axis=-1, keepdims=True)
        h = (h - mean) * jax.lax.rsqrt(var + eps) * gamma + beta
    return h


if __name__ == "__main__":
    key = jax.random.PRNGKey(0)

    # --- small config consistent with the module constructor ------------------
    input_size, hidden_size, output_size, layers = 16, 32, 8, 3
    batch = 8
    key, kx, kp = jax.random.split(key, 3)
    x = jax.random.normal(kx, (batch, input_size), jnp.float32)
    weights, biases = init_mlp_params(kp, input_size, hidden_size, output_size, layers)
    ln_params = (jnp.ones((output_size,), jnp.float32),
                 jnp.zeros((output_size,), jnp.float32))

    out = jax.block_until_ready(mlp_forward(x, weights, biases, ln_params))
    ref = mlp_reference(x, weights, biases, ln_params)
    assert out.shape == (batch, output_size)
    assert jnp.allclose(out, ref, atol=1e-4, rtol=1e-4), "f32 mismatch vs reference"

    # bf16 weights/activations, f32 accumulation (v5e/v6e/v7x MXU-native path).
    out_bf16 = jax.block_until_ready(
        mlp_forward(x, weights, biases, ln_params, compute_dtype=jnp.bfloat16))
    ref_bf16 = mlp_reference(x, weights, biases, ln_params,
                             compute_dtype=jnp.bfloat16)
    assert jnp.allclose(out_bf16, ref_bf16, atol=5e-2, rtol=5e-2), "bf16 mismatch"

    # --- batch large enough to exercise the grid / pipelining path ------------
    b2, i2, h2, o2, l2 = 300, 48, 96, 24, 2
    key, kx2, kp2 = jax.random.split(key, 3)
    x2 = jax.random.normal(kx2, (b2, i2), jnp.float32)
    w2, bia2 = init_mlp_params(kp2, i2, h2, o2, l2)
    ln2 = (jnp.ones((o2,), jnp.float32), jnp.zeros((o2,), jnp.float32))
    out2 = jax.block_until_ready(mlp_forward(x2, w2, bia2, ln2))
    ref2 = mlp_reference(x2, w2, bia2, ln2)
    assert out2.shape == (b2, o2)
    assert jnp.allclose(out2, ref2, atol=5e-4, rtol=5e-4), "grid-path mismatch"

    # layernorm=False path.
    out3 = jax.block_until_ready(mlp_forward(x, weights, biases, None))
    ref3 = mlp_reference(x, weights, biases, None)
    assert jnp.allclose(out3, ref3, atol=1e-4, rtol=1e-4), "no-LN mismatch"

    print("KERNEL_OK")
</pallas_src>

<mosaic_0001>
module attributes {stable_mosaic.version = 11 : i64} {
  func.func @kernel(%arg0: i32, %arg1: memref<8x128xf32, #tpu.memory_space<vmem>>, %arg2: memref<128x128xf32, #tpu.memory_space<vmem>>, %arg3: memref<1x128xf32, #tpu.memory_space<vmem>>, %arg4: memref<128x128xf32, #tpu.memory_space<vmem>>, %arg5: memref<1x128xf32, #tpu.memory_space<vmem>>, %arg6: memref<128x128xf32, #tpu.memory_space<vmem>>, %arg7: memref<1x128xf32, #tpu.memory_space<vmem>>, %arg8: memref<1x128xf32, #tpu.memory_space<vmem>>, %arg9: memref<1x128xf32, #tpu.memory_space<vmem>>, %arg10: memref<8x128xf32, #tpu.memory_space<vmem>>) attributes {dimension_semantics = [#tpu.dimension_semantics<parallel>], iteration_bounds = array<i64: 1>, scalar_prefetch = 0 : i64, scratch_operands = 0 : i64, tpu.core_type = #tpu.core_type<tc>, window_params = [{transform_indices = @transform_0, window_bounds = array<i64: 8, 128>}, {pipeline_mode = #tpu.pipeline_mode<synchronous>, transform_indices = @transform_1, window_bounds = array<i64: 128, 128>}, {pipeline_mode = #tpu.pipeline_mode<synchronous>, transform_indices = @transform_2, window_bounds = array<i64: 1, 128>}, {pipeline_mode = #tpu.pipeline_mode<synchronous>, transform_indices = @transform_3, window_bounds = array<i64: 128, 128>}, {pipeline_mode = #tpu.pipeline_mode<synchronous>, transform_indices = @transform_4, window_bounds = array<i64: 1, 128>}, {pipeline_mode = #tpu.pipeline_mode<synchronous>, transform_indices = @transform_5, window_bounds = array<i64: 128, 128>}, {pipeline_mode = #tpu.pipeline_mode<synchronous>, transform_indices = @transform_6, window_bounds = array<i64: 1, 128>}, {pipeline_mode = #tpu.pipeline_mode<synchronous>, transform_indices = @transform_7, window_bounds = array<i64: 1, 128>}, {pipeline_mode = #tpu.pipeline_mode<synchronous>, transform_indices = @transform_8, window_bounds = array<i64: 1, 128>}, {transform_indices = @transform_9, window_bounds = array<i64: 8, 128>}]} {
    %c0 = arith.constant 0 : index
    %c0_0 = arith.constant 0 : index
    %0 = vector.load %arg1[%c0, %c0_0] : memref<8x128xf32, #tpu.memory_space<vmem>>, vector<8x128xf32>
    %c0_1 = arith.constant 0 : index
    %c0_2 = arith.constant 0 : index
    %1 = vector.load %arg2[%c0_1, %c0_2] : memref<128x128xf32, #tpu.memory_space<vmem>>, vector<128x128xf32>
    %c0_3 = arith.constant 0 : index
    %c0_4 = arith.constant 0 : index
    %2 = vector.load %arg3[%c0_3, %c0_4] : memref<1x128xf32, #tpu.memory_space<vmem>>, vector<1x128xf32>
    %cst = arith.constant dense<0.000000e+00> : vector<8x128xf32>
    %3 = tpu.matmul %0, %1, %cst {dimension_numbers = #tpu.dot_dimension_numbers<[1], [0], [0], [1], [0, 0, 1, 1], [], []>} : vector<8x128xf32>, vector<128x128xf32>, vector<8x128xf32> -> vector<8x128xf32>
    %4 = vector.broadcast %2 : vector<1x128xf32> to vector<8x128xf32>
    %5 = arith.addf %3, %4 : vector<8x128xf32>
    %cst_5 = arith.constant 0.000000e+00 : f32
    %6 = vector.broadcast %cst_5 : f32 to vector<8x128xf32>
    %7 = arith.maximumf %5, %6 : vector<8x128xf32>
    %c0_6 = arith.constant 0 : index
    %c0_7 = arith.constant 0 : index
    %8 = vector.load %arg4[%c0_6, %c0_7] : memref<128x128xf32, #tpu.memory_space<vmem>>, vector<128x128xf32>
    %c0_8 = arith.constant 0 : index
    %c0_9 = arith.constant 0 : index
    %9 = vector.load %arg5[%c0_8, %c0_9] : memref<1x128xf32, #tpu.memory_space<vmem>>, vector<1x128xf32>
    %cst_10 = arith.constant dense<0.000000e+00> : vector<8x128xf32>
    %10 = tpu.matmul %7, %8, %cst_10 {dimension_numbers = #tpu.dot_dimension_numbers<[1], [0], [0], [1], [0, 0, 1, 1], [], []>} : vector<8x128xf32>, vector<128x128xf32>, vector<8x128xf32> -> vector<8x128xf32>
    %11 = vector.broadcast %9 : vector<1x128xf32> to vector<8x128xf32>
    %12 = arith.addf %10, %11 : vector<8x128xf32>
    %cst_11 = arith.constant 0.000000e+00 : f32
    %13 = vector.broadcast %cst_11 : f32 to vector<8x128xf32>
    %14 = arith.maximumf %12, %13 : vector<8x128xf32>
    %c0_12 = arith.constant 0 : index
    %c0_13 = arith.constant 0 : index
    %15 = vector.load %arg6[%c0_12, %c0_13] : memref<128x128xf32, #tpu.memory_space<vmem>>, vector<128x128xf32>
    %c0_14 = arith.constant 0 : index
    %c0_15 = arith.constant 0 : index
    %16 = vector.load %arg7[%c0_14, %c0_15] : memref<1x128xf32, #tpu.memory_space<vmem>>, vector<1x128xf32>
    %cst_16 = arith.constant dense<0.000000e+00> : vector<8x128xf32>
    %17 = tpu.matmul %14, %15, %cst_16 {dimension_numbers = #tpu.dot_dimension_numbers<[1], [0], [0], [1], [0, 0, 1, 1], [], []>} : vector<8x128xf32>, vector<128x128xf32>, vector<8x128xf32> -> vector<8x128xf32>
    %18 = vector.broadcast %16 : vector<1x128xf32> to vector<8x128xf32>
    %19 = arith.addf %17, %18 : vector<8x128xf32>
    %c0_17 = arith.constant 0 : index
    %c0_18 = arith.constant 0 : index
    %20 = vector.load %arg8[%c0_17, %c0_18] : memref<1x128xf32, #tpu.memory_space<vmem>>, vector<1x128xf32>
    %c0_19 = arith.constant 0 : index
    %c0_20 = arith.constant 0 : index
    %21 = vector.load %arg9[%c0_19, %c0_20] : memref<1x128xf32, #tpu.memory_space<vmem>>, vector<1x128xf32>
    %cst_21 = arith.constant dense<0.000000e+00> : vector<8xf32>
    %22 = vector.multi_reduction <add>, %19, %cst_21 [1] : vector<8x128xf32> to vector<8xf32>
    %23 = vector.shape_cast %22 : vector<8xf32> to vector<8x1xf32>
    %24 = arith.mulf %19, %19 : vector<8x128xf32>
    %cst_22 = arith.constant dense<0.000000e+00> : vector<8xf32>
    %25 = vector.multi_reduction <add>, %24, %cst_22 [1] : vector<8x128xf32> to vector<8xf32>
    %26 = vector.shape_cast %25 : vector<8xf32> to vector<8x1xf32>
    %cst_23 = arith.constant 1.250000e-01 : f32
    %27 = vector.broadcast %cst_23 : f32 to vector<8x1xf32>
    %28 = arith.mulf %23, %27 : vector<8x1xf32>
    %cst_24 = arith.constant 1.250000e-01 : f32
    %29 = vector.broadcast %cst_24 : f32 to vector<8x1xf32>
    %30 = arith.mulf %26, %29 : vector<8x1xf32>
    %31 = arith.mulf %28, %28 : vector<8x1xf32>
    %32 = arith.subf %30, %31 : vector<8x1xf32>
    %cst_25 = arith.constant 9.99999974E-6 : f32
    %33 = vector.broadcast %cst_25 : f32 to vector<8x1xf32>
    %34 = arith.addf %32, %33 : vector<8x1xf32>
    %35 = math.rsqrt %34 : vector<8x1xf32>
    %36 = vector.broadcast %28 : vector<8x1xf32> to vector<8x128xf32>
    %37 = arith.subf %19, %36 : vector<8x128xf32>
    %38 = vector.broadcast %35 : vector<8x1xf32> to vector<8x128xf32>
    %39 = arith.mulf %37, %38 : vector<8x128xf32>
    %40 = vector.broadcast %20 : vector<1x128xf32> to vector<8x128xf32>
    %41 = arith.mulf %39, %40 : vector<8x128xf32>
    %42 = vector.broadcast %21 : vector<1x128xf32> to vector<8x128xf32>
    %43 = arith.addf %41, %42 : vector<8x128xf32>
    %c0_26 = arith.constant 0 : index
    %c0_27 = arith.constant 0 : index
    %44 = vector.load %arg10[%c0_26, %c0_27] : memref<8x128xf32, #tpu.memory_space<vmem>>, vector<8x128xf32>
    tpu.vector_store %arg10[%c0_26, %c0_27], %43 {strides = array<i32>} : memref<8x128xf32, #tpu.memory_space<vmem>>, vector<8x128xf32>,
    return
  }
  func.func @transform_0(%arg0: i32) -> (i32, i32) {
    %c0_i32 = arith.constant 0 : i32
    %c0_i32_0 = arith.constant 0 : i32
    return %arg0, %c0_i32 : i32, i32
  }
  func.func @transform_1(%arg0: i32) -> (i32, i32) {
    %c0_i32 = arith.constant 0 : i32
    %c0_i32_0 = arith.constant 0 : i32
    %c0_i32_1 = arith.constant 0 : i32
    return %c0_i32, %c0_i32_0 : i32, i32
  }
  func.func @transform_2(%arg0: i32) -> (i32, i32) {
    %c0_i32 = arith.constant 0 : i32
    %c0_i32_0 = arith.constant 0 : i32
    %c0_i32_1 = arith.constant 0 : i32
    return %c0_i32, %c0_i32_0 : i32, i32
  }
  func.func @transform_3(%arg0: i32) -> (i32, i32) {
    %c0_i32 = arith.constant 0 : i32
    %c0_i32_0 = arith.constant 0 : i32
    %c0_i32_1 = arith.constant 0 : i32
    return %c0_i32, %c0_i32_0 : i32, i32
  }
  func.func @transform_4(%arg0: i32) -> (i32, i32) {
    %c0_i32 = arith.constant 0 : i32
    %c0_i32_0 = arith.constant 0 : i32
    %c0_i32_1 = arith.constant 0 : i32
    return %c0_i32, %c0_i32_0 : i32, i32
  }
  func.func @transform_5(%arg0: i32) -> (i32, i32) {
    %c0_i32 = arith.constant 0 : i32
    %c0_i32_0 = arith.constant 0 : i32
    %c0_i32_1 = arith.constant 0 : i32
    return %c0_i32, %c0_i32_0 : i32, i32
  }
  func.func @transform_6(%arg0: i32) -> (i32, i32) {
    %c0_i32 = arith.constant 0 : i32
    %c0_i32_0 = arith.constant 0 : i32
    %c0_i32_1 = arith.constant 0 : i32
    return %c0_i32, %c0_i32_0 : i32, i32
  }
  func.func @transform_7(%arg0: i32) -> (i32, i32) {
    %c0_i32 = arith.constant 0 : i32
    %c0_i32_0 = arith.constant 0 : i32
    %c0_i32_1 = arith.constant 0 : i32
    return %c0_i32, %c0_i32_0 : i32, i32
  }
  func.func @transform_8(%arg0: i32) -> (i32, i32) {
    %c0_i32 = arith.constant 0 : i32
    %c0_i32_0 = arith.constant 0 : i32
    %c0_i32_1 = arith.constant 0 : i32
    return %c0_i32, %c0_i32_0 : i32, i32
  }
  func.func @transform_9(%arg0: i32) -> (i32, i32) {
    %c0_i32 = arith.constant 0 : i32
    %c0_i32_0 = arith.constant 0 : i32
    return %arg0, %c0_i32 : i32, i32
  }
}

</mosaic_0001>

<bundles_post_ra>
// kernel: tpu_custom_call.1
= control target key start
LH: loop header
LB: loop body
LE: loop exit
PB: predicated region body
PF: predicated region fallthrough
CT: control target
= control target key end

     0   :  { %14 = vsyncpa [#allocation3], 0  ;;  %s952_s0 = inlined_call_operand.hbm [shape: f32[8,128], index: 0, kind: input, shape index: {}]   ;;  %s953_s1 = inlined_call_operand.hbm [shape: f32[128,128], index: 1, kind: input, shape index: {}]   ;;  %s954_s2 = inlined_call_operand.vmem [shape: f32[1,128], index: 2, kind: input, shape index: {}]   ;;  %s955_s3 = inlined_call_operand.hbm [shape: f32[128,128], index: 3, kind: input, shape index: {}]   ;;  %s956_s4 = inlined_call_operand.vmem [shape: f32[1,128], index: 4, kind: input, shape index: {}]   ;;  %s957_s5 = inlined_call_operand.hbm [shape: f32[128,128], index: 5, kind: input, shape index: {}]   ;;  %s958_s6 = inlined_call_operand.vmem [shape: f32[1,128], index: 6, kind: input, shape index: {}]   ;;  %s959_s7 = inlined_call_operand.vmem [shape: f32[1,128], index: 7, kind: input, shape index: {}]   ;;  %s960_s8 = inlined_call_operand.vmem [shape: f32[1,128], index: 8, kind: input, shape index: {}]   ;;  %s961_s9 = inlined_call_operand.hbm [shape: f32[8,128], index: 9, kind: output, shape index: {}]  }
   0x1   :  { %15 = vsyncpa [#allocation6], 0 }
   0x2   :  { %16 = vsyncpa [#allocation9], 0 }
   0x3   :  { %17 = vsyncpa [#allocation4], 0  ;;  %s778_s30 = smov [#allocation5]   ;;  %s660_s13 = scalar_lea.hbm %s953_s1, 2048 }
   0x4   :  { %s33_s10 = sshll.u32 %s778_s30, 4  ;;  %p661_p0 = scmp.ne.s32.totalorder %s953_s1, %s660_s13  ;;  %s34_s10 = int_to_ptr.vmem [resolvable:$true] %s33_s10 }
   0x5   :  { %p664_p1 = scmp.lt.u32.totalorder %s660_s13, %s953_s1 }
   0x7   :  { %p666_p2 = pnand %p664_p1, %p661_p0 }
   0x9   :  { %669 = shalt.err (!%p666_p2)
}
   0xa   :  { %s670_s18 = scalar_lea.vmem %s34_s10, 2048  ;;  %p675_p4 = scmp.lt.s32.totalorder %s34_s10, %s34_s10 }
   0xb   :  { %p671_p3 = scmp.ne.s32.totalorder %s34_s10, %s670_s18  ;;  %p676_p5 = scmp.lt.s32.totalorder %s670_s18, %s670_s18 }
   0xd   :  { %p677_p6 = por %p676_p5, %p675_p4 }
   0xf   :  { %p678_p7 = pnand %p677_p6, %p671_p3 }
  0x11   :  { %681 = shalt.err (!%p678_p7)
}
  0x12   :  { %s779_s19 = smov 128   ;;  %s780_s20 = smov 8  }
  0x13   :  { %39 = dma.hbm_to_vmem [thread:$0]  %s953_s1, 2048, %s34_s10, [#allocation6], %s779_s19, %s779_s19, %s780_s20  }
  0x14   :  { %s781_s23 = smov [#allocation2]   ;;  %s782_s25 = smov [#allocation7]  }
  0x15   :  { %s24_s24 = sshll.u32 %s781_s23, 4  ;;  %s47_s26 = sshll.u32 %s782_s25, 4  ;;  %s25_s24 = int_to_ptr.vmem [resolvable:$true] %s24_s24  ;;  %s48_s26 = int_to_ptr.vmem [resolvable:$true] %s47_s26 }
  0x16   :  { %s682_s29 = scalar_lea.hbm %s952_s0, 128 }
  0x17   :  { %p683_p8 = scmp.ne.s32.totalorder %s952_s0, %s682_s29  ;;  %p686_p9 = scmp.lt.u32.totalorder %s682_s29, %s952_s0 }
  0x19   :  { %p688_p10 = pnand %p686_p9, %p683_p8 }
  0x1b   :  { %691 = shalt.err (!%p688_p10)
}
  0x1c   :  { %s692_s1 = scalar_lea.vmem %s25_s24, 128  ;;  %p697_p12 = scmp.lt.s32.totalorder %s25_s24, %s25_s24 }
  0x1d   :  { %p693_p11 = scmp.ne.s32.totalorder %s25_s24, %s692_s1  ;;  %p698_p13 = scmp.lt.s32.totalorder %s692_s1, %s692_s1 }
  0x1f   :  { %p699_p0 = por %p698_p13, %p697_p12 }
  0x21   :  { %p700_p1 = pnand %p699_p0, %p693_p11 }
  0x23   :  { %703 = shalt.err (!%p700_p1)
}
  0x24   :  { %27 = dma.hbm_to_vmem [thread:$0]  %s952_s0, 128, %s25_s24, [#allocation3]  }
  0x25   :  { %s704_s17 = scalar_lea.hbm %s955_s3, 2048 }
  0x26   :  { %p705_p2 = scmp.ne.s32.totalorder %s955_s3, %s704_s17  ;;  %p708_p3 = scmp.lt.u32.totalorder %s704_s17, %s955_s3 }
  0x28   :  { %p710_p4 = pnand %p708_p3, %p705_p2 }
  0x2a   :  { %713 = shalt.err (!%p710_p4)
}
  0x2b   :  { %s714_s25 = scalar_lea.vmem %s48_s26, 2048  ;;  %p719_p6 = scmp.lt.s32.totalorder %s48_s26, %s48_s26 }
  0x2c   :  { %p715_p5 = scmp.ne.s32.totalorder %s48_s26, %s714_s25  ;;  %p720_p7 = scmp.lt.s32.totalorder %s714_s25, %s714_s25 }
  0x2e   :  { %p721_p8 = por %p720_p7, %p719_p6 }
  0x30   :  { %p722_p9 = pnand %p721_p8, %p715_p5 }
  0x32   :  { %725 = shalt.err (!%p722_p9)
}
  0x33   :  { %53 = dma.hbm_to_vmem [thread:$0]  %s955_s3, 2048, %s48_s26, [#allocation6], %s779_s19, %s779_s19, %s780_s20  }
  0x34   :  { %s783_s27 = smov [#allocation8]   ;;  %s726_s11 = scalar_lea.hbm %s957_s5, 2048 }
  0x35   :  { %s61_s28 = sshll.u32 %s783_s27, 4  ;;  %p727_p10 = scmp.ne.s32.totalorder %s957_s5, %s726_s11  ;;  %s62_s28 = int_to_ptr.vmem [resolvable:$true] %s61_s28 }
  0x36   :  { %p730_p11 = scmp.lt.u32.totalorder %s726_s11, %s957_s5 }
  0x38   :  { %p732_p12 = pnand %p730_p11, %p727_p10 }
  0x3a   :  { %735 = shalt.err (!%p732_p12)
}
  0x3b   :  { %s736_s14 = scalar_lea.vmem %s62_s28, 2048  ;;  %p741_p0 = scmp.lt.s32.totalorder %s62_s28, %s62_s28 }
  0x3c   :  { %p737_p13 = scmp.ne.s32.totalorder %s62_s28, %s736_s14  ;;  %p742_p1 = scmp.lt.s32.totalorder %s736_s14, %s736_s14 }
  0x3e   :  { %p743_p2 = por %p742_p1, %p741_p0 }
  0x40   :  { %p744_p3 = pnand %p743_p2, %p737_p13 }
  0x42   :  { %747 = shalt.err (!%p744_p3)
}
  0x43   :  { %67 = dma.hbm_to_vmem [thread:$0]  %s957_s5, 2048, %s62_s28, [#allocation9], %s779_s19, %s779_s19, %s780_s20  }
  0x44   :  { %770 = dma.done.wait [#allocation3], 128  }
  0x45   :  { %771 = vsyncadd [#allocation3], 4294967168 }
  0x46   :  { %772 = dma.done.wait [#allocation6], 4096  }
  0x47   :  { %773 = vsyncadd [#allocation6], 4294963200 }
  0x48   :  { %774 = dma.done.wait [#allocation9], 2048  }
  0x49   :  { %775 = vsyncadd [#allocation9], 4294965248  ;;  %v784_v0 = vmov 0.0|0.0   ;;  %vm785_vm0 = vmmov 0   ;;  %v786_v1 = vmov 0.0   ;;  %v87_v2 = vld [vmem:[#allocation5] sm:$0xff] }
  0x4a   :  { %576 = vmatprep.subr.bf16.mxu0 %v784_v0  ;;  %503 = vmatprep.mubr.msk.f32.mxu0 %vm785_vm0, %v786_v1  ;;  %v88_v3 = vld [vmem:[#allocation5 + $0x8] sm:$0xff]  ;;  %v89_v4 = vld [vmem:[#allocation5 + $0x10] sm:$0xff]  ;;  %v90_v6 = vld [vmem:[#allocation5 + $0x18] sm:$0xff]  ;;  %s787_s21 = smov [#allocation10]  }
  0x4b   :  { %600 = vmatprep.subr.bf16.mxu1 %v784_v0  ;;  %538 = vmatprep.mubr.msk.f32.mxu1 %vm785_vm0, %v786_v1  ;;  %v577_v5 = vpack.c.bf16 %v88_v3, %v87_v2  ;;  %v580_v7 = vpack.c.bf16 %v90_v6, %v89_v4  ;;  %v91_v8 = vld [vmem:[#allocation5 + $0x20] sm:$0xff]  ;;  %v92_v9 = vld [vmem:[#allocation5 + $0x28] sm:$0xff]  ;;  %v183_v12 = vld [vmem:[#allocation7 + $0x10] sm:$0xff]  ;;  %s404_s22 = sshll.u32 %s787_s21, 4  ;;  %s405_s22 = int_to_ptr.vmem [resolvable:$true] %s404_s22 }
  0x4c   :  { %v181_v10 = vld [vmem:[#allocation7] sm:$0xff]  ;;  %v182_v11 = vld [vmem:[#allocation7 + $0x8] sm:$0xff]  ;;  %v184_v13 = vld [vmem:[#allocation7 + $0x18] sm:$0xff]  ;;  %v583_v14 = vpack.c.bf16 %v92_v9, %v91_v8  ;;  %s748_s23 = scalar_lea.vmem %s405_s22, 128  ;;  %p753_p5 = scmp.lt.s32.totalorder %s405_s22, %s405_s22 }
  0x4d   :  { %578 = vmatpush3.bf16.msra.mxu0 %v577_v5  ;;  %v601_v15 = vpack.c.bf16 %v182_v11, %v181_v10  ;;  %v93_v16 = vld [vmem:[#allocation5 + $0x30] sm:$0xff]  ;;  %v94_v17 = vld [vmem:[#allocation5 + $0x38] sm:$0xff]  ;;  %v604_v18 = vpack.c.bf16 %v184_v13, %v183_v12  ;;  %v185_v19 = vld [vmem:[#allocation7 + $0x20] sm:$0xff]  ;;  %p749_p4 = scmp.ne.s32.totalorder %s405_s22, %s748_s23  ;;  %p754_p6 = scmp.lt.s32.totalorder %s748_s23, %s748_s23 }
  0x4e   :  { %579 = vmatprep.subr.bf16.mxu0 %v784_v0  ;;  %v186_v20 = vld [vmem:[#allocation7 + $0x28] sm:$0xff]  ;;  %v586_v21 = vpack.c.bf16 %v94_v17, %v93_v16  ;;  %v95_v22 = vld [vmem:[#allocation5 + $0x40] sm:$0xff]  ;;  %v187_v25 = vld [vmem:[#allocation7 + $0x30] sm:$0xff] }
  0x4f   :  { %602 = vmatpush3.bf16.msra.mxu1 %v601_v15  ;;  %v96_v23 = vld [vmem:[#allocation5 + $0x48] sm:$0xff]  ;;  %v607_v24 = vpack.c.bf16 %v186_v20, %v185_v19  ;;  %v188_v26 = vld [vmem:[#allocation7 + $0x38] sm:$0xff]  ;;  %v97_v28 = vld [vmem:[#allocation5 + $0x50] sm:$0xff]  ;;  %p755_p7 = por %p754_p6, %p753_p5 }
  0x50   :  { %603 = vmatprep.subr.bf16.mxu1 %v784_v0  ;;  %v589_v27 = vpack.c.bf16 %v96_v23, %v95_v22  ;;  %v98_v29 = vld [vmem:[#allocation5 + $0x58] sm:$0xff]  ;;  %v610_v30 = vpack.c.bf16 %v188_v26, %v187_v25  ;;  %v189_v31 = vld [vmem:[#allocation7 + $0x40] sm:$0xff]  ;;  %v190_v32 = vld [vmem:[#allocation7 + $0x48] sm:$0xff] }
  0x51   :  { %581 = vmatpush3.bf16.msra.mxu0 %v580_v7  ;;  %v592_v33 = vpack.c.bf16 %v98_v29, %v97_v28  ;;  %v99_v34 = vld [vmem:[#allocation5 + $0x60] sm:$0xff]  ;;  %v100_v35 = vld [vmem:[#allocation5 + $0x68] sm:$0xff]  ;;  %v613_v36 = vpack.c.bf16 %v190_v32, %v189_v31  ;;  %v191_v37 = vld [vmem:[#allocation7 + $0x50] sm:$0xff]  ;;  %p756_p8 = pnand %p755_p7, %p749_p4 }
  0x52   :  { %582 = vmatprep.subr.bf16.mxu0 %v784_v0  ;;  %v192_v38 = vld [vmem:[#allocation7 + $0x58] sm:$0xff]  ;;  %v595_v39 = vpack.c.bf16 %v100_v35, %v99_v34  ;;  %v101_v40 = vld [vmem:[#allocation5 + $0x70] sm:$0xff]  ;;  %v193_v43 = vld [vmem:[#allocation7 + $0x60] sm:$0xff] }
  0x53   :  { %605 = vmatpush3.bf16.msra.mxu1 %v604_v18  ;;  %v102_v41 = vld [vmem:[#allocation5 + $0x78] sm:$0xff]  ;;  %v616_v42 = vpack.c.bf16 %v192_v38, %v191_v37  ;;  %v194_v44 = vld [vmem:[#allocation7 + $0x68] sm:$0xff]  ;;  %v195_v48 = vld [vmem:[#allocation7 + $0x70] sm:$0xff] }
  0x54   :  { %606 = vmatprep.subr.bf16.mxu1 %v784_v0  ;;  %v598_v45 = vpack.c.bf16 %v102_v41, %v101_v40  ;;  %v619_v46 = vpack.c.bf16 %v194_v44, %v193_v43  ;;  %v86_v47 = vld [vmem:[#allocation2] sm:$0xff]  ;;  %v275_v51 = vld [vmem:[#allocation8] sm:$0xff]  ;;  %v276_v52 = vld [vmem:[#allocation8 + $0x8] sm:$0xff] }
  0x55   :  { %584 = vmatpush3.bf16.msra.mxu0 %v583_v14  ;;  %v196_v49 = vld [vmem:[#allocation7 + $0x78] sm:$0xff]  ;;  %v277_v53 = vld [vmem:[#allocation8 + $0x10] sm:$0xff]  ;;  %v625_v54 = vpack.c.bf16 %v276_v52, %v275_v51  ;;  %v279_v57 = vld [vmem:[#allocation8 + $0x20] sm:$0xff] }
  0x56   :  { %585 = vmatprep.subr.bf16.mxu0 %v784_v0  ;;  %v622_v50 = vpack.c.bf16 %v196_v49, %v195_v48  ;;  %v278_v55 = vld [vmem:[#allocation8 + $0x18] sm:$0xff]  ;;  %v280_v58 = vld [vmem:[#allocation8 + $0x28] sm:$0xff]  ;;  %v281_v60 = vld [vmem:[#allocation8 + $0x30] sm:$0xff] }
  0x57   :  { %608 = vmatpush3.bf16.msra.mxu1 %v607_v24  ;;  %v628_v56 = vpack.c.bf16 %v278_v55, %v277_v53  ;;  %v631_v59 = vpack.c.bf16 %v280_v58, %v279_v57  ;;  %v282_v61 = vld [vmem:[#allocation8 + $0x38] sm:$0xff]  ;;  %v283_v63 = vld [vmem:[#allocation8 + $0x40] sm:$0xff]  ;;  %v285_v3 = vld [vmem:[#allocation8 + $0x50] sm:$0xff] }
  0x58   :  { %609 = vmatprep.subr.bf16.mxu1 %v784_v0  ;;  %v634_v62 = vpack.c.bf16 %v282_v61, %v281_v60  ;;  %v286_v4 = vld [vmem:[#allocation8 + $0x58] sm:$0xff]  ;;  %v287_v6 = vld [vmem:[#allocation8 + $0x60] sm:$0xff]  ;;  %v288_v7 = vld [vmem:[#allocation8 + $0x68] sm:$0xff] }
  0x59   :  { %587 = vmatpush3.bf16.msra.mxu0 %v586_v21  ;;  %v640_v5 = vpack.c.bf16 %v286_v4, %v285_v3  ;;  %v643_v8 = vpack.c.bf16 %v288_v7, %v287_v6  ;;  %v415_v9 = vld [vmem:[%s954_s2] ss:$0 sm:$0xff]  ;;  %v289_v14 = vld [vmem:[#allocation8 + $0x70] sm:$0xff] }
  0x5a   :  { %588 = vmatprep.subr.bf16.mxu0 %v784_v0  ;;  %v290_v15 = vld [vmem:[#allocation8 + $0x78] sm:$0xff] }
  0x5b   :  { %611 = vmatpush3.bf16.msra.mxu1 %v610_v30  ;;  %v646_v16 = vpack.c.bf16 %v290_v15, %v289_v14  ;;  %v416_v17 = vld [vmem:[%s956_s4] ss:$0 sm:$0xff] }
  0x5c   :  { %612 = vmatprep.subr.bf16.mxu1 %v784_v0  ;;  %v417_v21 = vld [vmem:[%s958_s6] ss:$0 sm:$0xff] }
  0x5d   :  { %590 = vmatpush3.bf16.msra.mxu0 %v589_v27  ;;  %v418_v35 = vld [vmem:[%s959_s7] ss:$0 sm:$0xff] }
  0x5e   :  { %591 = vmatprep.subr.bf16.mxu0 %v784_v0  ;;  %v419_v37 = vld [vmem:[%s960_s8] ss:$0 sm:$0xff] }
  0x5f   :  { %614 = vmatpush3.bf16.msra.mxu1 %v613_v36 }
  0x60   :  { %615 = vmatprep.subr.bf16.mxu1 %v784_v0 }
  0x61   :  { %593 = vmatpush3.bf16.msra.mxu0 %v592_v33 }
  0x62   :  { %594 = vmatprep.subr.bf16.mxu0 %v784_v0 }
  0x63   :  { %617 = vmatpush3.bf16.msra.mxu1 %v616_v42 }
  0x64   :  { %618 = vmatprep.subr.bf16.mxu1 %v784_v0 }
  0x65   :  { %596 = vmatpush3.bf16.msra.mxu0 %v595_v39 }
  0x66   :  { %597 = vmatprep.subr.bf16.mxu0 %v784_v0 }
  0x67   :  { %620 = vmatpush3.bf16.msra.mxu1 %v619_v46 }
  0x68   :  { %621 = vmatprep.subr.bf16.mxu1 %v784_v0 }
  0x69   :  { %599 = vmatpush3.bf16.msra.mxu0 %v598_v45 }
  0x6a   :  { %624 = vmatprep.subr.bf16.mxu0 %v784_v0 }
  0x6b   :  { %623 = vmatpush3.bf16.msra.mxu1 %v622_v50 }
  0x6c   :  { %504 = vmatmul.mubr.f32.vlgmr.msra.gmra.mrb[0].mxu0 %v86_v47 }
  0x6d   :  { %573 = vmatprep.mubr.msk.f32.mxu0 %vm785_vm0, %v786_v1  ;;  %626 = vmatpush3.bf16.msra.mxu0 %v625_v54  ;;  %v284_v1 = vld [vmem:[#allocation8 + $0x48] sm:$0xff] }
  0x6e   :  { %627 = vmatprep.subr.bf16.mxu0 %v784_v0  ;;  %v637_v2 = vpack.c.bf16 %v284_v1, %v283_v63 }
  0x71   :  { %629 = vmatpush3.bf16.msra.mxu0 %v628_v56 }
  0x72   :  { %630 = vmatprep.subr.bf16.mxu0 %v784_v0 }
  0x75   :  { %632 = vmatpush3.bf16.msra.mxu0 %v631_v59 }
  0x76   :  { %633 = vmatprep.subr.bf16.mxu0 %v784_v0 }
  0x79   :  { %635 = vmatpush3.bf16.msra.mxu0 %v634_v62 }
  0x7a   :  { %636 = vmatprep.subr.bf16.mxu0 %v784_v0 }
  0x7d   :  { %638 = vmatpush3.bf16.msra.mxu0 %v637_v2 }
  0x7e   :  { %639 = vmatprep.subr.bf16.mxu0 %v784_v0 }
  0x81   :  { %641 = vmatpush3.bf16.msra.mxu0 %v640_v5 }
  0x82   :  { %642 = vmatprep.subr.bf16.mxu0 %v784_v0 }
  0x85   :  { %644 = vmatpush3.bf16.msra.mxu0 %v643_v8 }
  0x86   :  { %645 = vmatprep.subr.bf16.mxu0 %v784_v0 }
  0x89   :  { %647 = vmatpush3.bf16.msra.mxu0 %v646_v16 }
 0x13f   :  { %v176_v10 = vpop.f32.mrb[0].mxu0 }
 0x140   :  { %v177_v11 = vadd.f32 %v415_v9, %v176_v10  ;;  %v505_v12 = vpop.f32.mrb[1].mxu0 }
 0x142   :  { %v180_v13 = vmax.f32 %v177_v11, 0.0 }
 0x144   :  { %539 = vmatmul.mubr.f32.vlgmr.msra.gmra.mrb[0].mxu1 %v180_v13 }
 0x217   :  { %v270_v18 = vpop.f32.mrb[0].mxu1 }
 0x218   :  { %v271_v19 = vadd.f32 %v416_v17, %v270_v18  ;;  %v540_v0 = vpop.f32.mrb[1].mxu1 }
 0x21a   :  { %v274_v20 = vmax.f32 %v271_v19, 0.0 }
 0x21c   :  { %574 = vmatmul.mubr.f32.vlgmr.msra.gmra.mrb[2].mxu0 %v274_v20 }
 0x2ef   :  { %v364_v22 = vpop.f32.mrb[2].mxu0 }
 0x2f0   :  { %v365_v23 = vadd.f32 %v417_v21, %v364_v22  ;;  %v575_v24 = vpop.f32.mrb[3].mxu0 }
 0x2f2   :  { %370 = vadd.xlane.f32.xlu0 %v365_v23  ;;  %v372_v25 = vmul.f32 %v365_v23, %v365_v23 }
 0x2f6   :  { %373 = vadd.xlane.f32.xlu0 %v372_v25 }
 0x37f   :  { %v371_v26 = vpop.xlane.xlu0 %370 }
 0x380   :  { %v375_v27 = vmul.f32 0.125, %v371_v26 }
 0x382   :  { %v377_v29 = vmul.f32 %v375_v27, %v375_v27  ;;  %v381_v33 = vsub.f32 %v365_v23, %v375_v27 }
 0x383   :  { %v374_v28 = vpop.xlane.xlu0 %373 }
 0x384   :  { %v376_v30 = vmul.f32 0.125, %v374_v28 }
 0x386   :  { %v378_v31 = vsub.f32 %v376_v30, %v377_v29 }
 0x388   :  { %v379_v32 = vadd.f32 1e-05, %v378_v31 }
 0x38a   :  { %658 = vrsqrt.f32 %v379_v32 }
 0x394   :  { %v659_v34 = vpop.eup %658 }
 0x395   :  { %v382_v36 = vmul.f32 %v659_v34, %v381_v33 }
 0x397   :  { %v389_v38 = vmul.f32 %v418_v35, %v382_v36 }
 0x399   :  { %v396_v39 = vadd.f32 %v419_v37, %v389_v38 }
 0x39b   :  { %397 = vst [vmem:[#allocation10] sm:$0xff] %v396_v39 }
 0x39c   :  { %759 = shalt.err (!%p756_p8)
}
 0x39d   :  { %s760_s0 = scalar_lea.hbm %s961_s9, 128 }
 0x39e   :  { %p761_p9 = scmp.ne.s32.totalorder %s961_s9, %s760_s0  ;;  %p764_p10 = scmp.lt.u32.totalorder %s760_s0, %s961_s9 }
 0x3a0   :  { %p766_p11 = pnand %p764_p10, %p761_p9 }
 0x3a2   :  { %769 = shalt.err (!%p766_p11)
}
 0x3a3   :  { %407 = dma.vmem_to_hbm [thread:$0]  %s405_s22, 128, %s961_s9, [#allocation4]  }
 0x3a4   :  { %776 = dma.done.wait [#allocation4], 128  }
 0x3a5   :  { %777 = vsyncadd [#allocation4], 4294967168 }
 0x3a6   :  { %411 = vsyncpa [#allocation3], 1 }
 0x3a7   :  { %412 = vsyncpa [#allocation6], 1 }
 0x3a8   :  { %413 = vsyncpa [#allocation9], 1 }
 0x3a9   :  { %414 = vsyncpa [#allocation4], 1 }

</bundles_post_ra>
